<compile_context>
chip_gen: v5e
topology: v5e:2x2
jax: 0.10.0
libtpu: 0.0.40
codegen_flags: <defaults>
</compile_context>

<pallas_src>
import functools
import math

import jax
import jax.numpy as jnp
from jax import lax
from jax.experimental import pallas as pl
from jax.experimental.pallas import tpu as pltpu


_LANE = 128
_SUBLANE = 8
_GROUP = 8                 # tokens per gather/store group (one sublane tile)
_ONE_HOT_MAX_VOCAB = 1024  # keep <=1024 on v5e; could be raised to ~2048-4096
                           # on v6e/v7x now that the matmul is bf16.
_DEFAULT_TOKEN_TILE = 512


def _round_up(x, m):
    return (x + m - 1) // m * m


def _vmem_capacity_bytes():
    """Per-TensorCore VMEM (128 MiB v5e/v6e, 64 MiB v7x); safe fallback."""
    try:
        return int(pltpu.get_tpu_info().vmem_capacity_bytes)
    except Exception:
        return 64 << 20


# ---------------------------------------------------------------- kernels ----

def _onehot_kernel(ids_ref, table_ref, out_ref, *, vocab, scale):
    """Small-vocab path: lookup as a bf16 one-hot matmul on the MXU.

    ids_ref   : VMEM (tn, 1) int32 token ids for this tile
    table_ref : VMEM (V, Dp) bf16 embedding table (single resident copy)
    out_ref   : VMEM (tn, Dp) output tile (lane-dense store)
    """
    ids = ids_ref[...]                                         # (tn, 1)
    tn = ids.shape[0]
    iota = lax.broadcasted_iota(jnp.int32, (tn, vocab), 1)     # (tn, V)
    onehot = (iota == ids).astype(table_ref.dtype)             # exact 0/1 in bf16
    emb = jnp.dot(onehot, table_ref[...],
                  preferred_element_type=jnp.float32)          # (tn, Dp) f32 acc
    out_ref[...] = (emb * scale).astype(out_ref.dtype)


def _vmem_gather_kernel(ids_ref, table_ref, out_ref, *, tn, scale):
    """VMEM-resident table gather, grouped by 8 tokens.

    ids_ref   : SMEM (Np,) int32 (scalar prefetch)
    table_ref : VMEM (V, Dp) table (single resident copy)
    out_ref   : VMEM (tn, Dp) output tile

    Each group: 8 dynamic row loads, assembled into an (8, Dp) register tile
    via sublane-mask selects (VALU), scaled once, and written with a single
    unmasked full-sublane store.  No trailing rescale pass.
    """
    base = pl.program_id(0) * tn
    n_groups = tn // _GROUP
    dp = out_ref.shape[1]

    # (GROUP, 1) sublane-selection masks, hoisted out of the loop
    # (JAX does not CSE broadcast_in_dim inside loops).
    sub = lax.broadcasted_iota(jnp.int32, (_GROUP, 1), 0)
    masks = [sub == r for r in range(_GROUP)]

    def body(g, carry):
        g0 = base + g * _GROUP
        grp = jnp.zeros((_GROUP, dp), jnp.float32)
        for r in range(_GROUP):
            tok = ids_ref[g0 + r]                                   # SMEM scalar
            row = table_ref[pl.ds(tok, 1), :].astype(jnp.float32)   # (1, Dp)
            grp = jnp.where(masks[r], row, grp)                     # place row r
        row0 = pl.multiple_of(g * _GROUP, _GROUP)
        out_ref[pl.ds(row0, _GROUP), :] = (grp * scale).astype(out_ref.dtype)
        return carry

    lax.fori_loop(0, n_groups, body, 0, unroll=2)


def _hbm_gather_kernel(ids_ref, table_hbm, out_ref, rowbuf, sem, *, tn, scale):
    """HBM-resident table: manual double-buffered row-gather DMA (P4).

    ids_ref   : SMEM (Np,) int32 (scalar prefetch)
    table_hbm : HBM (V, Dp) table (memory_space=pl.ANY)
    out_ref   : VMEM (tn, Dp) output tile
    rowbuf    : VMEM (2*GROUP, Dp) double-buffered row staging
    sem       : DMA semaphores (2*GROUP,)
    """
    base = pl.program_id(0) * tn
    n_groups = tn // _GROUP

    def fetch(g, slot_off):
        g0 = base + g * _GROUP
        for r in range(_GROUP):
            tok = ids_ref[g0 + r]
            pltpu.make_async_copy(table_hbm.at[tok],
                                  rowbuf.at[slot_off + r],
                                  sem.at[slot_off + r]).start()

    fetch(0, 0)

    def body(g, carry):
        slot_off = (g & 1) * _GROUP
        for r in range(_GROUP):
            # src here only fixes shape/byte-count for the wait.
            pltpu.make_async_copy(table_hbm.at[0],
                                  rowbuf.at[slot_off + r],
                                  sem.at[slot_off + r]).wait()

        @pl.when(g + 1 < n_groups)
        def _():
            fetch(g + 1, _GROUP - slot_off)       # opposite slot

        rows = rowbuf[pl.ds(pl.multiple_of(slot_off, _GROUP), _GROUP), :]
        row0 = pl.multiple_of(g * _GROUP, _GROUP)
        out_ref[pl.ds(row0, _GROUP), :] = (rows * scale).astype(out_ref.dtype)
        return carry

    lax.fori_loop(0, n_groups, body, 0)


# ---------------------------------------------------------------- wrapper ----

def embeddings_forward(x, table, *, token_tile=_DEFAULT_TOKEN_TILE,
                       out_dtype=jnp.float32, force_path=None):
    """x: (B, S) integer indices; table: (V, D). Returns (B, S, D) out_dtype.

    out_dtype=jnp.bfloat16 halves HBM writeback if the downstream consumer
    takes bf16; default float32 matches nn.Embedding.
    """
    B, S = x.shape
    V, D = table.shape
    N = B * S
    scale = float(math.sqrt(D))
    out_itemsize = jnp.dtype(out_dtype).itemsize

    # Clamp out-of-range ids: nn.Embedding would raise, but on TPU an OOB
    # dynamic read / DMA is unchecked, so keep it safe.
    ids = jnp.clip(x.reshape(N).astype(jnp.int32), 0, V - 1)

    # Lane-dense last dim: pad D up to a multiple of 128 (padded columns are
    # zero and sliced off after the kernel) -> unmasked full-lane stores.
    Dp = _round_up(D, _LANE)
    if Dp != D:
        table = jnp.pad(table, ((0, 0), (0, Dp - D)))

    vmem_cap = _vmem_capacity_bytes()
    budget = vmem_cap * 3 // 4            # headroom for compiler scratch etc.

    table_res_bytes = V * Dp * table.dtype.itemsize
    table_bf16_bytes = V * Dp * 2

    # ---- generation-aware path selection -----------------------------------
    if force_path is None:
        if (V <= _ONE_HOT_MAX_VOCAB
                and table_bf16_bytes
                + 2 * _SUBLANE * (Dp * out_itemsize + 4 * V) <= budget):
            path = "onehot"
        elif table_res_bytes + 4 * _SUBLANE * Dp * out_itemsize <= budget:
            path = "vmem_gather"
        else:
            # Table too big for this generation's per-TC VMEM (e.g. v7x 64 MiB)
            path = "hbm_gather"
    else:
        path = force_path

    # ---- token-tile selection (VMEM-capped, >=2 grid steps for v7x) --------
    if path == "onehot":
        fixed_bytes = table_bf16_bytes
        per_tok_bytes = 2 * Dp * out_itemsize + 8 + 6 * V   # out dbl-buf + ids + onehot tmp
    elif path == "vmem_gather":
        fixed_bytes = table_res_bytes
        per_tok_bytes = 2 * Dp * out_itemsize
    else:  # hbm_gather
        fixed_bytes = 2 * _GROUP * Dp * table.dtype.itemsize
        per_tok_bytes = 2 * Dp * out_itemsize

    avail = max(budget - fixed_bytes, _SUBLANE * per_tok_bytes)
    tn = min(token_tile,
             max(_SUBLANE, (avail // per_tok_bytes) // _SUBLANE * _SUBLANE))
    if N >= 2 * _SUBLANE:
        # Split small/medium inputs into at least 2 tiles so v7x's second
        # TensorCore gets work under dimension_semantics=("parallel",).
        tn = min(tn, _round_up(pl.cdiv(N, 2), _SUBLANE))
    else:
        tn = min(tn, _round_up(N, _SUBLANE))
    tn = max(_SUBLANE, _round_up(tn, _SUBLANE))

    Np = _round_up(N, tn)
    if Np != N:
        ids = jnp.pad(ids, (0, Np - N))          # pad with token 0 (valid row)
    grid = (Np // tn,)

    vmem_limit = int(min(vmem_cap * 9 // 10,
                         max(32 << 20,
                             fixed_bytes + tn * per_tok_bytes + (16 << 20))))

    compiler_params = pltpu.CompilerParams(
        dimension_semantics=("parallel",),
        vmem_limit_bytes=vmem_limit,
    )
    out_shape = jax.ShapeDtypeStruct((Np, Dp), out_dtype)
    # Single resident copy of the table in VMEM (no double-buffered pipelining
    # of a block whose index never changes).
    resident_table_spec = pl.BlockSpec(memory_space=pltpu.MemorySpace.VMEM)

    if path == "onehot":
        # bf16 table -> native-rate MXU on v6e/v7x, half the VMEM footprint.
        # Embedding values round to bf16 precision on this path.
        out_flat = pl.pallas_call(
            functools.partial(_onehot_kernel, vocab=V, scale=scale),
            out_shape=out_shape,
            grid_spec=pltpu.PrefetchScalarGridSpec(
                num_scalar_prefetch=0,
                grid=grid,
                in_specs=[pl.BlockSpec((tn, 1), lambda i: (i, 0)),
                          resident_table_spec],
                out_specs=pl.BlockSpec((tn, Dp), lambda i: (i, 0)),
            ),
            compiler_params=compiler_params,
        )(ids.reshape(Np, 1), table.astype(jnp.bfloat16))

    elif path == "vmem_gather":
        out_flat = pl.pallas_call(
            functools.partial(_vmem_gather_kernel, tn=tn, scale=scale),
            out_shape=out_shape,
            grid_spec=pltpu.PrefetchScalarGridSpec(
                num_scalar_prefetch=1,           # ids -> SMEM (ceiling noted above)
                grid=grid,
                in_specs=[resident_table_spec],
                out_specs=pl.BlockSpec((tn, Dp), lambda i, ids_ref: (i, 0)),
            ),
            compiler_params=compiler_params,
        )(ids, table)

    else:  # hbm_gather
        out_flat = pl.pallas_call(
            functools.partial(_hbm_gather_kernel, tn=tn, scale=scale),
            out_shape=out_shape,
            grid_spec=pltpu.PrefetchScalarGridSpec(
                num_scalar_prefetch=1,           # ids -> SMEM
                grid=grid,
                in_specs=[pl.BlockSpec(memory_space=pl.ANY)],   # table stays in HBM
                out_specs=pl.BlockSpec((tn, Dp), lambda i, ids_ref: (i, 0)),
                scratch_shapes=[pltpu.VMEM((2 * _GROUP, Dp), table.dtype),
                                pltpu.SemaphoreType.DMA((2 * _GROUP,))],
            ),
            compiler_params=compiler_params,
        )(ids, table)

    return out_flat[:N, :D].reshape(B, S, D)


# ------------------------------------------------------------------ test -----

def _reference(x, table):
    V, D = table.shape
    return (jnp.take(table, x.reshape(-1), axis=0)
            .reshape(*x.shape, D) * math.sqrt(D))


if __name__ == "__main__":
    key = jax.random.PRNGKey(0)
    k1, k2, k3, k4, k5, k6 = jax.random.split(key, 6)

    # Config 1: toy module shapes (vocab=64, d_model=32, batch=2, seq=8)
    # -> one-hot bf16 MXU path; bf16-level tolerance.
    V1, D1, B1, S1 = 64, 32, 2, 8
    tab1 = jax.random.normal(k1, (V1, D1), dtype=jnp.float32)
    x1 = jax.random.randint(k2, (B1, S1), 0, V1, dtype=jnp.int32)
    out1 = jax.block_until_ready(embeddings_forward(x1, tab1))
    ref1 = _reference(x1, tab1)
    assert out1.shape == (B1, S1, D1)
    assert jnp.allclose(out1, ref1, atol=5e-2, rtol=2e-2)

    # Config 2: larger vocab -> VMEM-resident grouped gather path (exact).
    V2, D2, B2, S2 = 4096, 128, 2, 16
    tab2 = jax.random.normal(k3, (V2, D2), dtype=jnp.float32)
    x2 = jax.random.randint(k4, (B2, S2), 0, V2, dtype=jnp.int32)
    out2 = jax.block_until_ready(embeddings_forward(x2, tab2))
    ref2 = _reference(x2, tab2)
    assert out2.shape == (B2, S2, D2)
    assert jnp.allclose(out2, ref2, atol=1e-5, rtol=1e-5)

    # Config 3: force the HBM DMA-gather path (auto-selected when the table
    # exceeds the per-TC VMEM budget, e.g. realistic vocabs on v7x). Exact.
    V3, D3, B3, S3 = 512, 256, 2, 16
    tab3 = jax.random.normal(k5, (V3, D3), dtype=jnp.float32)
    x3 = jax.random.randint(k6, (B3, S3), 0, V3, dtype=jnp.int32)
    out3 = jax.block_until_ready(
        embeddings_forward(x3, tab3, force_path="hbm_gather"))
    ref3 = _reference(x3, tab3)
    assert out3.shape == (B3, S3, D3)
    assert jnp.allclose(out3, ref3, atol=1e-5, rtol=1e-5)

    print("KERNEL_OK")
</pallas_src>

<mosaic_0001>
module attributes {stable_mosaic.version = 11 : i64} {
  func.func @_onehot_kernel(%arg0: i32, %arg1: memref<8x1xi32, #tpu.memory_space<vmem>>, %arg2: memref<64x128xbf16, #tpu.memory_space<vmem>>, %arg3: memref<8x128xf32, #tpu.memory_space<vmem>>) attributes {dimension_semantics = [#tpu.dimension_semantics<parallel>], iteration_bounds = array<i64: 2>, scalar_prefetch = 0 : i64, scratch_operands = 0 : i64, tpu.core_type = #tpu.core_type<tc>, window_params = [{transform_indices = @transform_0, window_bounds = array<i64: 8, 1>}, {pipeline_mode = #tpu.pipeline_mode<synchronous>, transform_indices = @transform_1, window_bounds = array<i64: 64, 128>}, {transform_indices = @transform_2, window_bounds = array<i64: 8, 128>}]} {
    %c0 = arith.constant 0 : index
    %c0_0 = arith.constant 0 : index
    %0 = vector.load %arg1[%c0, %c0_0] : memref<8x1xi32, #tpu.memory_space<vmem>>, vector<8x1xi32>
    %1 = tpu.iota {dimensions = array<i32: 1>} : vector<8x64xi32>
    %2 = vector.broadcast %0 : vector<8x1xi32> to vector<8x64xi32>
    %3 = arith.cmpi eq, %1, %2 : vector<8x64xi32>
    %4 = arith.extui %3 : vector<8x64xi1> to vector<8x64xi32>
    %5 = arith.sitofp %4 : vector<8x64xi32> to vector<8x64xf32>
    %6 = arith.truncf %5 : vector<8x64xf32> to vector<8x64xbf16>
    %c0_1 = arith.constant 0 : index
    %c0_2 = arith.constant 0 : index
    %7 = vector.load %arg2[%c0_1, %c0_2] : memref<64x128xbf16, #tpu.memory_space<vmem>>, vector<64x128xbf16>
    %cst = arith.constant dense<0.000000e+00> : vector<8x128xf32>
    %8 = tpu.matmul %6, %7, %cst {dimension_numbers = #tpu.dot_dimension_numbers<[1], [0], [0], [1], [0, 0, 1, 1], [], []>} : vector<8x64xbf16>, vector<64x128xbf16>, vector<8x128xf32> -> vector<8x128xf32>
    %cst_3 = arith.constant 5.65685415 : f32
    %9 = vector.broadcast %cst_3 : f32 to vector<8x128xf32>
    %10 = arith.mulf %8, %9 : vector<8x128xf32>
    %c0_4 = arith.constant 0 : index
    %c0_5 = arith.constant 0 : index
    %11 = vector.load %arg3[%c0_4, %c0_5] : memref<8x128xf32, #tpu.memory_space<vmem>>, vector<8x128xf32>
    tpu.vector_store %arg3[%c0_4, %c0_5], %10 {strides = array<i32>} : memref<8x128xf32, #tpu.memory_space<vmem>>, vector<8x128xf32>,
    return
  }
  func.func @transform_0(%arg0: i32) -> (i32, i32) {
    %c0_i32 = arith.constant 0 : i32
    %c0_i32_0 = arith.constant 0 : i32
    return %arg0, %c0_i32 : i32, i32
  }
  func.func @transform_1(%arg0: i32) -> (i32, i32) {
    %c0_i32 = arith.constant 0 : i32
    %c0_i32_0 = arith.constant 0 : i32
    %c0_i32_1 = arith.constant 0 : i32
    return %c0_i32, %c0_i32_0 : i32, i32
  }
  func.func @transform_2(%arg0: i32) -> (i32, i32) {
    %c0_i32 = arith.constant 0 : i32
    %c0_i32_0 = arith.constant 0 : i32
    return %arg0, %c0_i32 : i32, i32
  }
}

</mosaic_0001>

<bundles_post_ra>
// kernel: tpu_custom_call.1
= control target key start
LH: loop header
LB: loop body
LE: loop exit
PB: predicated region body
PF: predicated region fallthrough
CT: control target
= control target key end

     0   :  { %7 = vsyncpa [#allocation3], 0  ;;  %s607_s0 = inlined_call_operand.vmem [shape: s32[16,1], index: 0, kind: input, shape index: {}]   ;;  %s608_s1 = inlined_call_operand.hbm [shape: bf16[64,128], index: 1, kind: input, shape index: {}]   ;;  %s609_s2 = inlined_call_operand.hbm [shape: f32[16,128], index: 2, kind: output, shape index: {}]  }
   0x1   :  { %8 = vsyncpa [#allocation4], 0 }
   0x2   :  { %10 = vsyncpa [#allocation4 + $0x1], 0  ;;  %s512_s9 = smov 0   ;;  %s514_s10 = smov 0  }
   0x3   :  { %s516_s11 = smov 0   ;;  %s518_s12 = smov 0  }
   0x4 LB: > { %s533_s13 = sadd.s32 4294967295, %s490_s12   ;;  %s305_s14 = sadd.s32 4294967294, %s490_s12   ;;  %s490_s12 = sphi %s518_s12, %s615_s12   ;;  %s486_s11 = sphi %s516_s11, %s614_s11   ;;  %s482_s10 = sphi %s514_s10, %s613_s10   ;;  %s478_s9 = sphi %s512_s9, %s612_s9  }
   0x5   : > { %s537_s15 = sadd.s32 1, %s490_s12   ;;  %s70_s16 = sadd.s32 1, %s486_s11 }
   0x6   : > { %s67_s17 = ssub.s32 %s490_s12, %s537_s15  ;;  %p80_p0 = scmp.ne.s32.totalorder %s486_s11, %s482_s10 }
   0x7   : > { %p68_p1 = scmp.eq.s32.totalorder %s67_s17, 0  ;;  %p81_p2 = scmp.eq.s32.totalorder %s533_s13, 1 }
   0x8   : > { %p86_p3 = scmp.ne.s32.totalorder %s482_s10, %s478_s9  ;;  %p87_p4 = scmp.eq.s32.totalorder %s305_s14, 1 }
   0x9   : > { %s548_s18 = scalar_select %p68_p1, %s486_s11, %s70_s16  }
   0xa   : > { %p550_p5 = por %p81_p2, %p80_p0  ;;  %p554_p6 = por %p87_p4, %p86_p3 }
   0xb   : > { %p306_p7 = scmp.ge.s32.totalorder %s490_s12, 1  ;;  %p94_p8 = scmp.lt.s32.totalorder %s490_s12, 3 }
   0xc   : > { %p353_p9 = scmp.eq.s32.totalorder %s533_s13, 0  ;;  %s105_s23 = sshll.u32 %s608_s1, 4  ;;  %s106_s23 = int_to_ptr.hbm [resolvable:$true] %s105_s23 }
   0xd   : > { %p95_p10 = pnand %p306_p7, %p94_p8  ;;  %s492_s24 = smov [#allocation2]  }
   0xe   : > { %s107_s25 = sshll.u32 %s492_s24, 4  ;;  %s493_s26 = smov 64   ;;  %s108_s25 = int_to_ptr.vmem [resolvable:$true] %s107_s25 }
   0xf   : > { %p345_p11 = pneg %p95_p10  ;;  %s494_s27 = smov 4  }
  0x10   : > { %130 = sbr.rel (%p95_p10) target bundleno = 282 (0x11a), region = 28 }
  0x11   : > { %p346_p12 = pnand %p353_p9, %p345_p11 }
  0x13   : > { %348 = dma.hbm_to_vmem [thread:$0]  (!%p346_p12), %s106_s23, 512, %s108_s25, [#allocation3], %s493_s26, %s493_s26, %s494_s27  }
  0x15   : > { %469 = dma.done.wait (%p353_p9), [#allocation3], 512  }
  0x16   : > { %471 = vsyncadd (%p353_p9), [#allocation3], 4294966784  ;;  %p152_p13 = scmp.lt.s32.totalorder %s533_s13, 1  ;;  %v495_v0 = vmov 0   ;;  %v338_v2 = vld [vmem:[#allocation2 + $0x18] sm:$0xff]  ;;  %v337_v3 = vld [vmem:[#allocation2 + $0x10] sm:$0xff]  ;;  %v158_v6 = vlaneseq }
  0x17   : > { %393 = vset.pattern.permute.xlu0 %v495_v0  ;;  %207 = vmatpush.bf16.msra.mxu0 %v338_v2  ;;  %v336_v4 = vld [vmem:[#allocation2 + $0x8] sm:$0xff]  ;;  %v335_v5 = vld [vmem:[#allocation2] sm:$0xff]  ;;  %v496_v9 = vmov 0.0   ;;  %vm199_vm1 = vcmask 523264   ;;  %s149_s5 = sand.u32 1, %s482_s10   ;;  %s332_s6 = sshll.u32 %s533_s13, 3 }
  0x18   : > { %s153_s28 = scalar_select %p152_p13, %s533_s13, 1  ;;  %v159_v7 = vand.u32 127, %v158_v6 }
  0x19   : > { %s311_s7 = sshll.u32 %s149_s5, 3  ;;  %s229_s16 = scalar_lea.hbm %s609_s2, %s332_s6 }
  0x1a   : > { %s312_s29 = sshll.u32 %s153_s28, 3  ;;  %s151_s17 = scalar_lea.vmem [#allocation5], %s311_s7 }
  0x1b   : > { %s155_s4 = scalar_lea.vmem %s607_s0, %s312_s29  ;;  %208 = vmatpush.bf16.msra.mxu0 %v337_v3  ;;  %s231_s21 = sshll.u32 %s151_s17, 4  ;;  %s232_s21 = int_to_ptr.vmem [resolvable:$true] %s231_s21 }
  0x1c   : > { %v157_v1 = vld [vmem:[%s155_s4] sm:$0xff]  ;;  %s233_s22 = sshll.u32 %s229_s16, 4  ;;  %s219_s23 = scalar_lea.sflag [#allocation4], %s149_s5  ;;  %s234_s22 = int_to_ptr.hbm [resolvable:$true] %s233_s22 }
  0x1d   : > { %161 = vperm.xlu0 %393, %v157_v1   ;;  %s438_s24 = sshra.s32 %s234_s22, 4  ;;  %s444_s27 = scalar_lea.hbm %s609_s2, 16  ;;  %s439_s24 = int_to_ptr.hbm [resolvable:$true] %s438_s24 }
  0x1e   : > { %s440_s25 = scalar_lea.hbm %s439_s24, 8  ;;  %p445_p3 = scmp.lt.s32.totalorder %s439_s24, %s609_s2 }
  0x1f   : > { %209 = vmatpush.bf16.msra.mxu0 %v336_v4  ;;  %p441_p0 = scmp.ne.s32.totalorder %s439_s24, %s440_s25  ;;  %p446_p4 = scmp.lt.s32.totalorder %s444_s27, %s440_s25 }
  0x21   : > { %p442_p1 = pnand %p441_p0, %p550_p5  ;;  %p447_p7 = por %p446_p4, %p445_p3 }
  0x23   : > { %210 = vmatpush.bf16.msra.mxu0 %v335_v5  ;;  %p443_p2 = pneg %p442_p1 }
  0x25   : > { %p448_p8 = pnand %p447_p7, %p443_p2 }
  0x8f   : > { %v162_v8 = vpop.permute.xlu0 %161 }
  0x90   : > { %vm163_vm0 = vcmp.eq.s32.totalorder %v159_v7, %v162_v8 }
  0x91   : > { %v313_v10 = vsel %vm163_vm0, 1.0, %v496_v9 }
  0x92   : > { %v166_v11 = vpack.c.bf16 %v313_v10, %v313_v10 }
  0x94   : > { %330 = vmatmul.msk.bf16.vlgmr.msra.gmra.mxu0 %vm199_vm1, %v166_v11 }
 0x111   : > { %v212_v12 = vpop.f32.mrf.mxu0 }
 0x112   : > { %v216_v13 = vmul.f32 5.656854, %v212_v12 }
 0x114   : > { %217 = vst [vmem:[%s151_s17] sm:$0xff] %v216_v13 }
 0x115   : > { %451 = shalt.err (!%p448_p8)
}
 0x116   : > { %343 = dma.vmem_to_hbm [thread:$0]  (%p550_p5), %s232_s21, 128, %s234_s22, %s219_s23  }
 0x119   : > { %v214_v14 = vpop.f32.mrf.mxu0 }
 0x11a PF: > { %p355_p9 = scmp.ge.s32.totalorder %s490_s12, 2  ;;  %s245_s30 = sand.u32 1, %s478_s9  }
 0x11b   : > { %s246_s3 = scalar_lea.sflag [#allocation4], %s245_s30 }
 0x11c   : > { %p350_p10 = pnand %p355_p9, %p554_p6 }
 0x11e   : > { %p351_p11 = pneg %p350_p10 }
 0x120   : > { %473 = dma.done.wait (%p351_p11), %s246_s3, 128  }
 0x121   : > { %475 = vsyncadd (%p351_p11), %s246_s3, 4294967168  ;;  %p13_p12 = scmp.ge.s32.totalorder %s537_s15, 4   ;;  %s612_s9 = smov %s482_s10 }
 0x122   : > { %s613_s10 = smov %s486_s11  ;;  %s614_s11 = smov %s548_s18 }
 0x123   : > { %s615_s12 = smov %s537_s15  ;;  %15 = sbr.rel (!%p13_p12) target bundleno = 4 (0x4), region = 68 }
 0x128   :  { %252 = vsyncpa [#allocation3], 1 }
 0x129   :  { %254 = vsyncpa [#allocation3 + $0x1], 1 }
 0x12a   :  { %255 = vsyncpa [#allocation4], 1 }
 0x12b   :  { %257 = vsyncpa [#allocation4 + $0x1], 1 }

</bundles_post_ra>
